<compile_context>
chip_gen: v6e
topology: v6e:2x2x1
jax: 0.10.0
libtpu: 0.0.40
codegen_flags: <defaults>
</compile_context>

<pallas_src>
import jax
import jax.numpy as jnp
from jax.experimental import pallas as pl
from jax.experimental.pallas import tpu as pltpu


def _round_up(x, m):
    return ((x + m - 1) // m) * m


def encoder_kernel(x_ref, w1_ref, b1_ref, w2_ref, b2_ref,
                   w3_ref, b3_ref, w4_ref, b4_ref, o_ref):
    # fc1 + relu  (bf16 operands -> f32 accumulate; elementwise stays f32)
    h = jnp.dot(x_ref[...], w1_ref[...], preferred_element_type=jnp.float32)
    h = jnp.maximum(h + b1_ref[...], 0.0)
    # fc2 + relu
    h = jnp.dot(h.astype(jnp.bfloat16), w2_ref[...],
                preferred_element_type=jnp.float32)
    h = jnp.maximum(h + b2_ref[...], 0.0)
    # fc3 + relu
    h = jnp.dot(h.astype(jnp.bfloat16), w3_ref[...],
                preferred_element_type=jnp.float32)
    h = jnp.maximum(h + b3_ref[...], 0.0)
    # fc4 (no activation), lane-dense 128-wide store
    o = jnp.dot(h.astype(jnp.bfloat16), w4_ref[...],
                preferred_element_type=jnp.float32)
    o_ref[...] = (o + b4_ref[...]).astype(o_ref.dtype)


def encoder_forward(x, params, *, block_m=512):
    """Run the fused 4-layer MLP encoder as one batch-tiled Pallas kernel."""
    (w1, b1), (w2, b2), (w3, b3), (w4, b4) = params
    batch, input_dim = x.shape
    encoded_dim = w4.shape[1]

    # Lane-dense output: pad fc4 out_features up to a multiple of 128 (zeros),
    # so the final store is an unmasked full-lane vst; slice real cols outside.
    out_pad = _round_up(max(encoded_dim, 1), 128)
    if out_pad != encoded_dim:
        w4 = jnp.pad(w4, ((0, 0), (0, out_pad - encoded_dim)))
        b4 = jnp.pad(b4, ((0, 0), (0, out_pad - encoded_dim)))

    # MXU-aligned batch tile; pad batch so BM divides it (pad rows sliced off).
    bm = min(block_m, _round_up(batch, 256))
    batch_pad = _round_up(batch, bm)
    if batch_pad != batch:
        x = jnp.pad(x, ((0, batch_pad - batch), (0, 0)))

    # bf16 matmul operands; biases / accumulation stay f32.
    x_bf16 = x.astype(jnp.bfloat16)
    w1b, w2b, w3b, w4b = (w.astype(jnp.bfloat16) for w in (w1, w2, w3, w4))

    def resident(arr):
        # Whole array as one block, same index every grid step -> DMA'd once
        # and kept resident in VMEM across all batch tiles.
        return pl.BlockSpec(arr.shape, lambda i: (0, 0))

    out_padded = pl.pallas_call(
        encoder_kernel,
        out_shape=jax.ShapeDtypeStruct((batch_pad, out_pad), jnp.float32),
        grid=(batch_pad // bm,),
        in_specs=[
            pl.BlockSpec((bm, input_dim), lambda i: (i, 0)),   # x: batch-tiled
            resident(w1b), resident(b1),
            resident(w2b), resident(b2),
            resident(w3b), resident(b3),
            resident(w4b), resident(b4),
        ],
        out_specs=pl.BlockSpec((bm, out_pad), lambda i: (i, 0)),
        compiler_params=pltpu.CompilerParams(
            dimension_semantics=("parallel",)),
    )(x_bf16, w1b, b1, w2b, b2, w3b, b3, w4b, b4)

    return out_padded[:batch, :encoded_dim]


def init_linear(key, in_features, out_features):
    """PyTorch-style init U(-1/sqrt(in), 1/sqrt(in)).

    W returned as (in_features, out_features) (already transposed), b as
    (1, out_features) so the kernel broadcasts it over the batch tile.
    """
    kw, kb = jax.random.split(key)
    bound = 1.0 / jnp.sqrt(jnp.float32(in_features))
    w = jax.random.uniform(kw, (in_features, out_features), jnp.float32,
                           minval=-bound, maxval=bound)
    b = jax.random.uniform(kb, (1, out_features), jnp.float32,
                           minval=-bound, maxval=bound)
    return w, b


def make_encoder_params(key, input_dim, encoded_dim):
    k1, k2, k3, k4 = jax.random.split(key, 4)
    return (
        init_linear(k1, input_dim, 256),
        init_linear(k2, 256, 128),
        init_linear(k3, 128, 64),
        init_linear(k4, 64, encoded_dim),
    )


def encoder_reference_bf16(x, params):
    """Plain-JAX reference mimicking the kernel's bf16-operand / f32-acc dots."""
    def mm(a, w):
        return jnp.dot(a.astype(jnp.bfloat16), w.astype(jnp.bfloat16),
                       preferred_element_type=jnp.float32)
    (w1, b1), (w2, b2), (w3, b3), (w4, b4) = params
    h = jnp.maximum(mm(x, w1) + b1, 0.0)
    h = jnp.maximum(mm(h, w2) + b2, 0.0)
    h = jnp.maximum(mm(h, w3) + b3, 0.0)
    return mm(h, w4) + b4


def encoder_reference_f32(x, params):
    """Full-precision reference (matches the PyTorch module semantics)."""
    (w1, b1), (w2, b2), (w3, b3), (w4, b4) = params
    h = jnp.maximum(x @ w1 + b1, 0.0)
    h = jnp.maximum(h @ w2 + b2, 0.0)
    h = jnp.maximum(h @ w3 + b3, 0.0)
    return h @ w4 + b4


if __name__ == "__main__":
    key = jax.random.PRNGKey(0)
    kx, kp = jax.random.split(key)

    batch = 8
    input_dim = 32      # small stand-in for the dataset feature dim
    encoded_dim = 10    # matches argparse default --encoded_dim=10

    x = jax.random.normal(kx, (batch, input_dim), jnp.float32)
    params = make_encoder_params(kp, input_dim, encoded_dim)

    out = encoder_forward(x, params)
    out = jax.block_until_ready(out)

    ref_bf16 = encoder_reference_bf16(x, params)
    ref_f32 = encoder_reference_f32(x, params)

    assert out.shape == (batch, encoded_dim)
    # Tight check vs. the bf16-operand reference (same numerics as the kernel).
    assert jnp.allclose(out, ref_bf16, atol=2e-2, rtol=2e-2)
    # Looser check vs. the pure-f32 PyTorch-equivalent reference.
    assert jnp.allclose(out, ref_f32, atol=5e-2, rtol=5e-2)

    print("KERNEL_OK")
</pallas_src>

<mosaic_0001>
module attributes {stable_mosaic.version = 11 : i64} {
  func.func @encoder_kernel(%arg0: i32, %arg1: memref<256x32xbf16, #tpu.memory_space<vmem>>, %arg2: memref<32x256xbf16, #tpu.memory_space<vmem>>, %arg3: memref<1x256xf32, #tpu.memory_space<vmem>>, %arg4: memref<256x128xbf16, #tpu.memory_space<vmem>>, %arg5: memref<1x128xf32, #tpu.memory_space<vmem>>, %arg6: memref<128x64xbf16, #tpu.memory_space<vmem>>, %arg7: memref<1x64xf32, #tpu.memory_space<vmem>>, %arg8: memref<64x128xbf16, #tpu.memory_space<vmem>>, %arg9: memref<1x128xf32, #tpu.memory_space<vmem>>, %arg10: memref<256x128xf32, #tpu.memory_space<vmem>>) attributes {dimension_semantics = [#tpu.dimension_semantics<parallel>], iteration_bounds = array<i64: 1>, scalar_prefetch = 0 : i64, scratch_operands = 0 : i64, tpu.core_type = #tpu.core_type<tc>, window_params = [{transform_indices = @transform_0, window_bounds = array<i64: 256, 32>}, {pipeline_mode = #tpu.pipeline_mode<synchronous>, transform_indices = @transform_1, window_bounds = array<i64: 32, 256>}, {pipeline_mode = #tpu.pipeline_mode<synchronous>, transform_indices = @transform_2, window_bounds = array<i64: 1, 256>}, {pipeline_mode = #tpu.pipeline_mode<synchronous>, transform_indices = @transform_3, window_bounds = array<i64: 256, 128>}, {pipeline_mode = #tpu.pipeline_mode<synchronous>, transform_indices = @transform_4, window_bounds = array<i64: 1, 128>}, {pipeline_mode = #tpu.pipeline_mode<synchronous>, transform_indices = @transform_5, window_bounds = array<i64: 128, 64>}, {pipeline_mode = #tpu.pipeline_mode<synchronous>, transform_indices = @transform_6, window_bounds = array<i64: 1, 64>}, {pipeline_mode = #tpu.pipeline_mode<synchronous>, transform_indices = @transform_7, window_bounds = array<i64: 64, 128>}, {pipeline_mode = #tpu.pipeline_mode<synchronous>, transform_indices = @transform_8, window_bounds = array<i64: 1, 128>}, {transform_indices = @transform_9, window_bounds = array<i64: 256, 128>}]} {
    %c0 = arith.constant 0 : index
    %c0_0 = arith.constant 0 : index
    %0 = vector.load %arg1[%c0, %c0_0] : memref<256x32xbf16, #tpu.memory_space<vmem>>, vector<256x32xbf16>
    %c0_1 = arith.constant 0 : index
    %c0_2 = arith.constant 0 : index
    %1 = vector.load %arg2[%c0_1, %c0_2] : memref<32x256xbf16, #tpu.memory_space<vmem>>, vector<32x256xbf16>
    %cst = arith.constant dense<0.000000e+00> : vector<256x256xf32>
    %2 = tpu.matmul %0, %1, %cst {dimension_numbers = #tpu.dot_dimension_numbers<[1], [0], [0], [1], [0, 0, 1, 1], [], []>} : vector<256x32xbf16>, vector<32x256xbf16>, vector<256x256xf32> -> vector<256x256xf32>
    %c0_3 = arith.constant 0 : index
    %c0_4 = arith.constant 0 : index
    %3 = vector.load %arg3[%c0_3, %c0_4] : memref<1x256xf32, #tpu.memory_space<vmem>>, vector<1x256xf32>
    %4 = vector.broadcast %3 : vector<1x256xf32> to vector<256x256xf32>
    %5 = arith.addf %2, %4 : vector<256x256xf32>
    %cst_5 = arith.constant 0.000000e+00 : f32
    %6 = vector.broadcast %cst_5 : f32 to vector<256x256xf32>
    %7 = arith.maximumf %5, %6 : vector<256x256xf32>
    %8 = arith.truncf %7 : vector<256x256xf32> to vector<256x256xbf16>
    %c0_6 = arith.constant 0 : index
    %c0_7 = arith.constant 0 : index
    %9 = vector.load %arg4[%c0_6, %c0_7] : memref<256x128xbf16, #tpu.memory_space<vmem>>, vector<256x128xbf16>
    %cst_8 = arith.constant dense<0.000000e+00> : vector<256x128xf32>
    %10 = tpu.matmul %8, %9, %cst_8 {dimension_numbers = #tpu.dot_dimension_numbers<[1], [0], [0], [1], [0, 0, 1, 1], [], []>} : vector<256x256xbf16>, vector<256x128xbf16>, vector<256x128xf32> -> vector<256x128xf32>
    %c0_9 = arith.constant 0 : index
    %c0_10 = arith.constant 0 : index
    %11 = vector.load %arg5[%c0_9, %c0_10] : memref<1x128xf32, #tpu.memory_space<vmem>>, vector<1x128xf32>
    %12 = vector.broadcast %11 : vector<1x128xf32> to vector<256x128xf32>
    %13 = arith.addf %10, %12 : vector<256x128xf32>
    %cst_11 = arith.constant 0.000000e+00 : f32
    %14 = vector.broadcast %cst_11 : f32 to vector<256x128xf32>
    %15 = arith.maximumf %13, %14 : vector<256x128xf32>
    %16 = arith.truncf %15 : vector<256x128xf32> to vector<256x128xbf16>
    %c0_12 = arith.constant 0 : index
    %c0_13 = arith.constant 0 : index
    %17 = vector.load %arg6[%c0_12, %c0_13] : memref<128x64xbf16, #tpu.memory_space<vmem>>, vector<128x64xbf16>
    %cst_14 = arith.constant dense<0.000000e+00> : vector<256x64xf32>
    %18 = tpu.matmul %16, %17, %cst_14 {dimension_numbers = #tpu.dot_dimension_numbers<[1], [0], [0], [1], [0, 0, 1, 1], [], []>} : vector<256x128xbf16>, vector<128x64xbf16>, vector<256x64xf32> -> vector<256x64xf32>
    %c0_15 = arith.constant 0 : index
    %c0_16 = arith.constant 0 : index
    %19 = vector.load %arg7[%c0_15, %c0_16] : memref<1x64xf32, #tpu.memory_space<vmem>>, vector<1x64xf32>
    %20 = vector.broadcast %19 : vector<1x64xf32> to vector<256x64xf32>
    %21 = arith.addf %18, %20 : vector<256x64xf32>
    %cst_17 = arith.constant 0.000000e+00 : f32
    %22 = vector.broadcast %cst_17 : f32 to vector<256x64xf32>
    %23 = arith.maximumf %21, %22 : vector<256x64xf32>
    %24 = arith.truncf %23 : vector<256x64xf32> to vector<256x64xbf16>
    %c0_18 = arith.constant 0 : index
    %c0_19 = arith.constant 0 : index
    %25 = vector.load %arg8[%c0_18, %c0_19] : memref<64x128xbf16, #tpu.memory_space<vmem>>, vector<64x128xbf16>
    %cst_20 = arith.constant dense<0.000000e+00> : vector<256x128xf32>
    %26 = tpu.matmul %24, %25, %cst_20 {dimension_numbers = #tpu.dot_dimension_numbers<[1], [0], [0], [1], [0, 0, 1, 1], [], []>} : vector<256x64xbf16>, vector<64x128xbf16>, vector<256x128xf32> -> vector<256x128xf32>
    %c0_21 = arith.constant 0 : index
    %c0_22 = arith.constant 0 : index
    %27 = vector.load %arg9[%c0_21, %c0_22] : memref<1x128xf32, #tpu.memory_space<vmem>>, vector<1x128xf32>
    %28 = vector.broadcast %27 : vector<1x128xf32> to vector<256x128xf32>
    %29 = arith.addf %26, %28 : vector<256x128xf32>
    %c0_23 = arith.constant 0 : index
    %c0_24 = arith.constant 0 : index
    %30 = vector.load %arg10[%c0_23, %c0_24] : memref<256x128xf32, #tpu.memory_space<vmem>>, vector<256x128xf32>
    tpu.vector_store %arg10[%c0_23, %c0_24], %29 {strides = array<i32>} : memref<256x128xf32, #tpu.memory_space<vmem>>, vector<256x128xf32>,
    return
  }
  func.func @transform_0(%arg0: i32) -> (i32, i32) {
    %c0_i32 = arith.constant 0 : i32
    %c0_i32_0 = arith.constant 0 : i32
    return %arg0, %c0_i32 : i32, i32
  }
  func.func @transform_1(%arg0: i32) -> (i32, i32) {
    %c0_i32 = arith.constant 0 : i32
    %c0_i32_0 = arith.constant 0 : i32
    %c0_i32_1 = arith.constant 0 : i32
    return %c0_i32, %c0_i32_0 : i32, i32
  }
  func.func @transform_2(%arg0: i32) -> (i32, i32) {
    %c0_i32 = arith.constant 0 : i32
    %c0_i32_0 = arith.constant 0 : i32
    %c0_i32_1 = arith.constant 0 : i32
    return %c0_i32, %c0_i32_0 : i32, i32
  }
  func.func @transform_3(%arg0: i32) -> (i32, i32) {
    %c0_i32 = arith.constant 0 : i32
    %c0_i32_0 = arith.constant 0 : i32
    %c0_i32_1 = arith.constant 0 : i32
    return %c0_i32, %c0_i32_0 : i32, i32
  }
  func.func @transform_4(%arg0: i32) -> (i32, i32) {
    %c0_i32 = arith.constant 0 : i32
    %c0_i32_0 = arith.constant 0 : i32
    %c0_i32_1 = arith.constant 0 : i32
    return %c0_i32, %c0_i32_0 : i32, i32
  }
  func.func @transform_5(%arg0: i32) -> (i32, i32) {
    %c0_i32 = arith.constant 0 : i32
    %c0_i32_0 = arith.constant 0 : i32
    %c0_i32_1 = arith.constant 0 : i32
    return %c0_i32, %c0_i32_0 : i32, i32
  }
  func.func @transform_6(%arg0: i32) -> (i32, i32) {
    %c0_i32 = arith.constant 0 : i32
    %c0_i32_0 = arith.constant 0 : i32
    %c0_i32_1 = arith.constant 0 : i32
    return %c0_i32, %c0_i32_0 : i32, i32
  }
  func.func @transform_7(%arg0: i32) -> (i32, i32) {
    %c0_i32 = arith.constant 0 : i32
    %c0_i32_0 = arith.constant 0 : i32
    %c0_i32_1 = arith.constant 0 : i32
    return %c0_i32, %c0_i32_0 : i32, i32
  }
  func.func @transform_8(%arg0: i32) -> (i32, i32) {
    %c0_i32 = arith.constant 0 : i32
    %c0_i32_0 = arith.constant 0 : i32
    %c0_i32_1 = arith.constant 0 : i32
    return %c0_i32, %c0_i32_0 : i32, i32
  }
  func.func @transform_9(%arg0: i32) -> (i32, i32) {
    %c0_i32 = arith.constant 0 : i32
    %c0_i32_0 = arith.constant 0 : i32
    return %arg0, %c0_i32 : i32, i32
  }
}

</mosaic_0001>

<bundles_post_ra>
// kernel: tpu_custom_call.1
= control target key start
LH: loop header
LB: loop body
LE: loop exit
PB: predicated region body
PF: predicated region fallthrough
CT: control target
= control target key end

     0   :  { %v1852_v2 = vmov 0   ;;  %vm182_vm0 = vcmask 261120   ;;  %s2283_s0 = inlined_call_operand.vmem [shape: bf16[256,32], index: 0, kind: input, shape index: {}]   ;;  %s2284_s1 = inlined_call_operand.vmem [shape: bf16[32,256], index: 1, kind: input, shape index: {}]   ;;  %s2285_s2 = inlined_call_operand.vmem [shape: f32[1,256], index: 2, kind: input, shape index: {}]   ;;  %s2286_s3 = inlined_call_operand.vmem [shape: bf16[256,128], index: 3, kind: input, shape index: {}]   ;;  %s2287_s4 = inlined_call_operand.vmem [shape: f32[1,128], index: 4, kind: input, shape index: {}]   ;;  %s2288_s5 = inlined_call_operand.vmem [shape: bf16[128,64], index: 5, kind: input, shape index: {}]   ;;  %s2289_s6 = inlined_call_operand.vmem [shape: f32[1,64], index: 6, kind: input, shape index: {}]   ;;  %s2290_s7 = inlined_call_operand.vmem [shape: bf16[64,128], index: 7, kind: input, shape index: {}]   ;;  %s2291_s8 = inlined_call_operand.vmem [shape: f32[1,128], index: 8, kind: input, shape index: {}]   ;;  %s2292_s9 = inlined_call_operand.hbm [shape: f32[256,128], index: 9, kind: output, shape index: {}]  }
   0x1   :  { %v1780_v0 = vld [vmem:[%s2284_s1 + $0x14] ss:$8 sps:$4 sm:$0xff]   ;;  %v1782_v1 = vld [vmem:[%s2284_s1 + $0x10] ss:$8 sps:$4 sm:$0xff]   ;;  %263 = vmatprep.mubr.bf16.mxu0 %v1852_v2  ;;  %v1783_v3 = vld [vmem:[%s2284_s1 + $0x4] ss:$8 sps:$4 sm:$0xff]  }
   0x2   :  { %243 = vmatprep.subr.bf16.mxu0 %v1780_v0  ;;  %v1785_v4 = vld [vmem:[%s2284_s1] ss:$8 sps:$4 sm:$0xff]   ;;  %v1802_v7 = vld [vmem:[%s2286_s3 + $0x78] sm:$0xff]   ;;  %v1788_v8 = vld [vmem:[%s2283_s0 + $0x10] sm:$0xff]  }
   0x3   :  { %244 = vmatpush1.bf16.msra.mxu0 %v1782_v1  ;;  %v1786_v5 = vld [vmem:[%s2283_s0] sm:$0xff]   ;;  %v1787_v6 = vld [vmem:[%s2283_s0 + $0x8] sm:$0xff]   ;;  %v1803_v9 = vld [vmem:[%s2286_s3 + $0x38] sm:$0xff]   ;;  %1524 = vmatprep.subr.bf16.mxu1 %v1802_v7 }
   0x4   :  { %245 = vmatprep.subr.bf16.mxu0 %v1783_v3  ;;  %v1804_v10 = vld [vmem:[%s2286_s3 + $0x70] sm:$0xff]   ;;  %1525 = vmatpush3.bf16.msra.mxu1 %v1803_v9  ;;  %v1806_v12 = vld [vmem:[%s2286_s3 + $0x68] sm:$0xff]   ;;  %v1808_v14 = vld [vmem:[%s2286_s3 + $0x60] sm:$0xff]  }
   0x5   :  { %v1805_v11 = vld [vmem:[%s2286_s3 + $0x30] sm:$0xff]   ;;  %1526 = vmatprep.subr.bf16.mxu1 %v1804_v10  ;;  %v1807_v13 = vld [vmem:[%s2286_s3 + $0x28] sm:$0xff]   ;;  %v1789_v15 = vld [vmem:[%s2283_s0 + $0x18] sm:$0xff]  }
   0x6   :  { %v1809_v16 = vld [vmem:[%s2286_s3 + $0x20] sm:$0xff]   ;;  %v1810_v17 = vld [vmem:[%s2286_s3 + $0x58] sm:$0xff]  }
   0x7   :  { %246 = vmatpush1.bf16.msra.mxu0 %v1785_v4  ;;  %v1811_v18 = vld [vmem:[%s2286_s3 + $0x18] sm:$0xff]   ;;  %v1790_v19 = vld [vmem:[%s2283_s0 + $0x20] sm:$0xff]  }
   0x8   :  { %1527 = vmatpush3.bf16.msra.mxu1 %v1805_v11 }
   0x9   :  { %1528 = vmatprep.subr.bf16.mxu1 %v1806_v12 }
   0xa   :  { %1461 = vmatmul.mubr.msk.bf16.vlgmr.msra.gmra.mxu0 %vm182_vm0, %v1786_v5 }
   0xb   :  { %273 = vmatprep.mubr.bf16.mxu0 %v1852_v2 }
   0xc   :  { %1529 = vmatpush3.bf16.msra.mxu1 %v1807_v13 }
   0xd   :  { %1530 = vmatprep.subr.bf16.mxu1 %v1808_v14 }
  0x10   :  { %1531 = vmatpush3.bf16.msra.mxu1 %v1809_v16 }
  0x11   :  { %1532 = vmatprep.subr.bf16.mxu1 %v1810_v17 }
  0x12   :  { %1462 = vmatmul.mubr.msk.bf16.gmra.mxu0 %vm182_vm0, %v1787_v6 }
  0x13   :  { %283 = vmatprep.mubr.bf16.mxu0 %v1852_v2 }
  0x14   :  { %1533 = vmatpush3.bf16.msra.mxu1 %v1811_v18 }
  0x1a   :  { %1463 = vmatmul.mubr.msk.bf16.gmra.mxu0 %vm182_vm0, %v1788_v8 }
  0x1b   :  { %293 = vmatprep.mubr.bf16.mxu0 %v1852_v2 }
  0x22   :  { %1464 = vmatmul.mubr.msk.bf16.gmra.mxu0 %vm182_vm0, %v1789_v15 }
  0x23   :  { %303 = vmatprep.mubr.bf16.mxu0 %v1852_v2 }
  0x24   :  { %14 = vsyncpa [#allocation3], 0  ;;  %v1791_v20 = vld [vmem:[%s2283_s0 + $0x28] sm:$0xff]   ;;  %v1792_v21 = vld [vmem:[%s2283_s0 + $0x30] sm:$0xff]   ;;  %v72_v37 = vlaneseq  ;;  %vm1183_vm1 = vcmask 523264  }
  0x25   :  { %v1793_v22 = vld [vmem:[%s2283_s0 + $0x38] sm:$0xff]   ;;  %v1794_v23 = vld [vmem:[%s2283_s0 + $0x40] sm:$0xff]   ;;  %v1812_v24 = vld [vmem:[%s2286_s3 + $0x50] sm:$0xff]  }
  0x26   :  { %v1813_v25 = vld [vmem:[%s2286_s3 + $0x10] sm:$0xff]   ;;  %1534 = vmatprep.subr.bf16.mxu1 %v1812_v24  ;;  %v1795_v26 = vld [vmem:[%s2283_s0 + $0x48] sm:$0xff]   ;;  %v1816_v29 = vld [vmem:[%s2286_s3 + $0x40] sm:$0xff]   ;;  %v73_v38 = vshrl.u32 %v72_v37, 7 }
  0x27   :  { %1535 = vmatpush3.bf16.msra.mxu1 %v1813_v25  ;;  %v1814_v27 = vld [vmem:[%s2286_s3 + $0x48] sm:$0xff]   ;;  %v1817_v30 = vld [vmem:[%s2286_s3] sm:$0xff]   ;;  %v1796_v31 = vld [vmem:[%s2283_s0 + $0x50] sm:$0xff]  }
  0x28   :  { %v1815_v28 = vld [vmem:[%s2286_s3 + $0x8] sm:$0xff]   ;;  %1536 = vmatprep.subr.bf16.mxu1 %v1814_v27  ;;  %v1797_v32 = vld [vmem:[%s2283_s0 + $0x58] sm:$0xff]   ;;  %v1798_v33 = vld [vmem:[%s2283_s0 + $0x60] sm:$0xff]   ;;  %v78_v39 = vsub.s32 1, %v73_v38  ;;  %v74_v40 = vsub.s32 0, %v73_v38 }
  0x29   :  { %v1799_v34 = vld [vmem:[%s2283_s0 + $0x68] sm:$0xff]   ;;  %v1800_v35 = vld [vmem:[%s2283_s0 + $0x70] sm:$0xff]   ;;  %v1801_v36 = vld [vmem:[%s2283_s0 + $0x78] sm:$0xff]  }
  0x2a   :  { %1465 = vmatmul.mubr.msk.bf16.gmra.mxu0 %vm182_vm0, %v1790_v19  ;;  %v70_v41 = vld [vmem:[%s2285_s2] sm:$0x3]  ;;  %v1818_v51 = vld [vmem:[%s2288_s5 + $0x38] sm:$0xff]   ;;  %v1819_v52 = vld [vmem:[%s2288_s5 + $0x30] sm:$0xff]  }
  0x2b   :  { %313 = vmatprep.mubr.bf16.mxu0 %v1852_v2  ;;  %1537 = vmatpush3.bf16.msra.mxu1 %v1815_v28  ;;  %v2049_v43 = vrot.slane %v70_v41, %v78_v39  ;;  %v2051_v44 = vrot.slane %v70_v41, %v74_v40  ;;  %v1820_v60 = vld [vmem:[%s2288_s5 + $0x28] sm:$0xff]   ;;  %v1821_v4 = vld [vmem:[%s2288_s5 + $0x20] sm:$0xff]  }
  0x2c   :  { %1538 = vmatprep.subr.bf16.mxu1 %v1816_v29  ;;  %1680 = vmatprep.subr.bf16.mxu0 %v1818_v51 }
  0x2d   :  { %1681 = vmatpush3.bf16.msra.mxu0 %v1818_v51 }
  0x2e   :  { %1682 = vmatprep.subr.bf16.mxu0 %v1819_v52 }
  0x2f   :  { %1539 = vmatpush3.bf16.msra.mxu1 %v1817_v30 }
  0x31   :  { %1683 = vmatpush3.bf16.msra.mxu0 %v1819_v52 }
  0x32   :  { %1466 = vmatmul.mubr.msk.bf16.gmra.mxu0 %vm182_vm0, %v1791_v20  ;;  %1684 = vmatprep.subr.bf16.mxu0 %v1820_v60 }
  0x33   :  { %323 = vmatprep.mubr.bf16.mxu0 %v1852_v2 }
  0x35   :  { %1685 = vmatpush3.bf16.msra.mxu0 %v1820_v60 }
  0x36   :  { %1686 = vmatprep.subr.bf16.mxu0 %v1821_v4 }
  0x39   :  { %1687 = vmatpush3.bf16.msra.mxu0 %v1821_v4 }
  0x3a   :  { %1467 = vmatmul.mubr.msk.bf16.gmra.mxu0 %vm182_vm0, %v1792_v21 }
  0x3b   :  { %333 = vmatprep.mubr.bf16.mxu0 %v1852_v2 }
  0x42   :  { %1468 = vmatmul.mubr.msk.bf16.gmra.mxu0 %vm182_vm0, %v1793_v22 }
  0x43   :  { %343 = vmatprep.mubr.bf16.mxu0 %v1852_v2 }
  0x4a   :  { %1469 = vmatmul.mubr.msk.bf16.gmra.mxu0 %vm182_vm0, %v1794_v23 }
  0x4b   :  { %353 = vmatprep.mubr.bf16.mxu0 %v1852_v2 }
  0x52   :  { %1470 = vmatmul.mubr.msk.bf16.gmra.mxu0 %vm182_vm0, %v1795_v26 }
  0x53   :  { %363 = vmatprep.mubr.bf16.mxu0 %v1852_v2 }
  0x5a   :  { %1471 = vmatmul.mubr.msk.bf16.gmra.mxu0 %vm182_vm0, %v1796_v31 }
  0x5b   :  { %373 = vmatprep.mubr.bf16.mxu0 %v1852_v2 }
  0x62   :  { %1472 = vmatmul.mubr.msk.bf16.gmra.mxu0 %vm182_vm0, %v1797_v32 }
  0x63   :  { %383 = vmatprep.mubr.bf16.mxu0 %v1852_v2 }
  0x6a   :  { %1473 = vmatmul.mubr.msk.bf16.gmra.mxu0 %vm182_vm0, %v1798_v33 }
  0x6b   :  { %393 = vmatprep.mubr.bf16.mxu0 %v1852_v2 }
  0x72   :  { %1474 = vmatmul.mubr.msk.bf16.gmra.mxu0 %vm182_vm0, %v1799_v34 }
  0x73   :  { %403 = vmatprep.mubr.bf16.mxu0 %v1852_v2 }
  0x7a   :  { %1475 = vmatmul.mubr.msk.bf16.gmra.mxu0 %vm182_vm0, %v1800_v35 }
  0x7b   :  { %413 = vmatprep.mubr.bf16.mxu0 %v1852_v2 }
  0x82   :  { %1476 = vmatmul.mubr.msk.bf16.gmra.mxu0 %vm182_vm0, %v1801_v36 }
  0xca   :  { %v265_v42 = vpop.f32.mrf.mxu0 }
  0xcb   :  { %v266_v49 = vadd.f32 %v265_v42, %v2051_v44 }
  0xcc   :  { %v267_v45 = vpop.f32.mrf.mxu0 }
  0xcd   :  { %v268_v47 = vadd.f32 %v267_v45, %v2049_v43  ;;  %v424_v58 = vmax.f32 %v266_v49, 0.0 }
  0xce   :  { %v269_v46 = vpop.f32.mrf.mxu0 }
  0xcf   :  { %v270_v48 = vadd.f32 %v269_v46, %v2051_v44  ;;  %v425_v56 = vmax.f32 %v268_v47, 0.0 }
  0xd0   :  { %v271_v50 = vpop.f32.mrf.mxu0 }
  0xd1   :  { %v272_v53 = vadd.f32 %v271_v50, %v2049_v43  ;;  %v426_v54 = vmax.f32 %v270_v48, 0.0 }
  0xd2   :  { %v275_v55 = vpop.f32.mrf.mxu0 }
  0xd3   :  { %v427_v57 = vmax.f32 %v272_v53, 0.0  ;;  %v488_v62 = vpack.c.bf16 %v426_v54, %v424_v58  ;;  %v276_v2 = vadd.f32 %v275_v55, %v2051_v44 }
  0xd4   :  { %v277_v59 = vpop.f32.mrf.mxu0 }
  0xd5   :  { %v489_v61 = vpack.c.bf16 %v427_v57, %v425_v56  ;;  %v278_v0 = vadd.f32 %v277_v59, %v2049_v43  ;;  %v428_v10 = vmax.f32 %v276_v2, 0.0 }
  0xd6   :  { %v279_v63 = vpop.f32.mrf.mxu0 }
  0xd7   :  { %v280_v1 = vadd.f32 %v279_v63, %v2051_v44  ;;  %687 = vmatprep.mubr.bf16.mxu1 %v489_v61  ;;  %v429_v8 = vmax.f32 %v278_v0, 0.0 }
  0xd8   :  { %v281_v3 = vpop.f32.mrf.mxu0  ;;  %688 = vmatmul.mubr.bf16.vlgmr.msra.gmra.mxu1 %v488_v62 }
  0xd9   :  { %v282_v5 = vadd.f32 %v281_v3, %v2049_v43  ;;  %v430_v6 = vmax.f32 %v280_v1, 0.0 }
  0xda   :  { %v285_v7 = vpop.f32.mrf.mxu0 }
  0xdb   :  { %v431_v9 = vmax.f32 %v282_v5, 0.0  ;;  %v490_v13 = vpack.c.bf16 %v430_v6, %v428_v10  ;;  %v286_v17 = vadd.f32 %v285_v7, %v2051_v44 }
  0xdc   :  { %v287_v11 = vpop.f32.mrf.mxu0 }
  0xdd   :  { %v491_v12 = vpack.c.bf16 %v431_v9, %v429_v8  ;;  %v288_v15 = vadd.f32 %v287_v11, %v2049_v43  ;;  %v432_v24 = vmax.f32 %v286_v17, 0.0 }
  0xde   :  { %v289_v14 = vpop.f32.mrf.mxu0 }
  0xdf   :  { %v290_v16 = vadd.f32 %v289_v14, %v2051_v44  ;;  %695 = vmatprep.mubr.bf16.mxu1 %v491_v12  ;;  %v433_v22 = vmax.f32 %v288_v15, 0.0 }
  0xe0   :  { %v291_v18 = vpop.f32.mrf.mxu0  ;;  %696 = vmatmul.mubr.bf16.gmra.mxu1 %v490_v13 }
  0xe1   :  { %v292_v19 = vadd.f32 %v291_v18, %v2049_v43  ;;  %v434_v20 = vmax.f32 %v290_v16, 0.0 }
  0xe2   :  { %v295_v21 = vpop.f32.mrf.mxu0 }
  0xe3   :  { %v435_v23 = vmax.f32 %v292_v19, 0.0  ;;  %v492_v27 = vpack.c.bf16 %v434_v20, %v432_v24  ;;  %v296_v31 = vadd.f32 %v295_v21, %v2051_v44 }
  0xe4   :  { %v297_v25 = vpop.f32.mrf.mxu0 }
  0xe5   :  { %v493_v26 = vpack.c.bf16 %v435_v23, %v433_v22  ;;  %v298_v29 = vadd.f32 %v297_v25, %v2049_v43  ;;  %v436_v38 = vmax.f32 %v296_v31, 0.0 }
  0xe6   :  { %v299_v28 = vpop.f32.mrf.mxu0 }
  0xe7   :  { %v300_v30 = vadd.f32 %v299_v28, %v2051_v44  ;;  %703 = vmatprep.mubr.bf16.mxu1 %v493_v26  ;;  %v437_v36 = vmax.f32 %v298_v29, 0.0 }
  0xe8   :  { %v301_v32 = vpop.f32.mrf.mxu0  ;;  %704 = vmatmul.mubr.bf16.gmra.mxu1 %v492_v27 }
  0xe9   :  { %v302_v33 = vadd.f32 %v301_v32, %v2049_v43  ;;  %v438_v34 = vmax.f32 %v300_v30, 0.0 }
  0xea   :  { %v305_v35 = vpop.f32.mrf.mxu0 }
  0xeb   :  { %v439_v37 = vmax.f32 %v302_v33, 0.0  ;;  %v494_v41 = vpack.c.bf16 %v438_v34, %v436_v38  ;;  %v306_v47 = vadd.f32 %v305_v35, %v2051_v44 }
  0xec   :  { %v307_v39 = vpop.f32.mrf.mxu0 }
  0xed   :  { %v495_v40 = vpack.c.bf16 %v439_v37, %v437_v36  ;;  %v308_v45 = vadd.f32 %v307_v39, %v2049_v43  ;;  %v440_v54 = vmax.f32 %v306_v47, 0.0 }
  0xee   :  { %v309_v42 = vpop.f32.mrf.mxu0 }
  0xef   :  { %v310_v46 = vadd.f32 %v309_v42, %v2051_v44  ;;  %711 = vmatprep.mubr.bf16.mxu1 %v495_v40  ;;  %v441_v52 = vmax.f32 %v308_v45, 0.0 }
  0xf0   :  { %v311_v48 = vpop.f32.mrf.mxu0  ;;  %712 = vmatmul.mubr.bf16.gmra.mxu1 %v494_v41 }
  0xf1   :  { %v312_v49 = vadd.f32 %v311_v48, %v2049_v43  ;;  %v442_v50 = vmax.f32 %v310_v46, 0.0 }
  0xf2   :  { %v315_v51 = vpop.f32.mrf.mxu0 }
  0xf3   :  { %v443_v53 = vmax.f32 %v312_v49, 0.0  ;;  %v496_v57 = vpack.c.bf16 %v442_v50, %v440_v54  ;;  %v316_v61 = vadd.f32 %v315_v51, %v2051_v44 }
  0xf4   :  { %v317_v55 = vpop.f32.mrf.mxu0 }
  0xf5   :  { %v497_v56 = vpack.c.bf16 %v443_v53, %v441_v52  ;;  %v318_v59 = vadd.f32 %v317_v55, %v2049_v43  ;;  %v444_v4 = vmax.f32 %v316_v61, 0.0 }
  0xf6   :  { %v319_v58 = vpop.f32.mrf.mxu0 }
  0xf7   :  { %v320_v60 = vadd.f32 %v319_v58, %v2051_v44  ;;  %719 = vmatprep.mubr.bf16.mxu1 %v497_v56  ;;  %v445_v2 = vmax.f32 %v318_v59, 0.0 }
  0xf8   :  { %v321_v62 = vpop.f32.mrf.mxu0  ;;  %720 = vmatmul.mubr.bf16.gmra.mxu1 %v496_v57 }
  0xf9   :  { %v322_v63 = vadd.f32 %v321_v62, %v2049_v43  ;;  %v446_v0 = vmax.f32 %v320_v60, 0.0 }
  0xfa   :  { %v325_v1 = vpop.f32.mrf.mxu0 }
  0xfb   :  { %v447_v3 = vmax.f32 %v322_v63, 0.0  ;;  %v498_v7 = vpack.c.bf16 %v446_v0, %v444_v4  ;;  %v326_v11 = vadd.f32 %v325_v1, %v2051_v44  ;;  %v1822_v1 = vld [vmem:[%s2288_s5 + $0x18] sm:$0xff]  }
  0xfc   :  { %v327_v5 = vpop.f32.mrf.mxu0  ;;  %1688 = vmatprep.subr.bf16.mxu0 %v1822_v1 }
  0xfd   :  { %v499_v6 = vpack.c.bf16 %v447_v3, %v445_v2  ;;  %v328_v9 = vadd.f32 %v327_v5, %v2049_v43  ;;  %v448_v18 = vmax.f32 %v326_v11, 0.0  ;;  %1689 = vmatpush3.bf16.msra.mxu0 %v1822_v1 }
  0xfe   :  { %v329_v8 = vpop.f32.mrf.mxu0 }
  0xff   :  { %v330_v10 = vadd.f32 %v329_v8, %v2051_v44  ;;  %727 = vmatprep.mubr.bf16.mxu1 %v499_v6  ;;  %v449_v16 = vmax.f32 %v328_v9, 0.0  ;;  %v1823_v9 = vld [vmem:[%s2288_s5 + $0x10] sm:$0xff]  }
 0x100   :  { %v331_v12 = vpop.f32.mrf.mxu0  ;;  %728 = vmatmul.mubr.bf16.gmra.mxu1 %v498_v7  ;;  %1690 = vmatprep.subr.bf16.mxu0 %v1823_v9 }
 0x101   :  { %v332_v13 = vadd.f32 %v331_v12, %v2049_v43  ;;  %v450_v14 = vmax.f32 %v330_v10, 0.0  ;;  %1691 = vmatpush3.bf16.msra.mxu0 %v1823_v9 }
 0x102   :  { %v335_v15 = vpop.f32.mrf.mxu0 }
 0x103   :  { %v451_v17 = vmax.f32 %v332_v13, 0.0  ;;  %v500_v21 = vpack.c.bf16 %v450_v14, %v448_v18  ;;  %v336_v25 = vadd.f32 %v335_v15, %v2051_v44 }
 0x104   :  { %v337_v19 = vpop.f32.mrf.mxu0 }
 0x105   :  { %v501_v20 = vpack.c.bf16 %v451_v17, %v449_v16  ;;  %v338_v23 = vadd.f32 %v337_v19, %v2049_v43  ;;  %v452_v32 = vmax.f32 %v336_v25, 0.0  ;;  %v1824_v17 = vld [vmem:[%s2288_s5 + $0x8] sm:$0xff]   ;;  %v1825_v25 = vld [vmem:[%s2288_s5] sm:$0xff]  }
 0x106   :  { %v339_v22 = vpop.f32.mrf.mxu0  ;;  %1692 = vmatprep.subr.bf16.mxu0 %v1824_v17 }
 0x107   :  { %v340_v24 = vadd.f32 %v339_v22, %v2051_v44  ;;  %735 = vmatprep.mubr.bf16.mxu1 %v501_v20  ;;  %v453_v30 = vmax.f32 %v338_v23, 0.0  ;;  %1693 = vmatpush3.bf16.msra.mxu0 %v1824_v17 }
 0x108   :  { %v341_v26 = vpop.f32.mrf.mxu0  ;;  %736 = vmatmul.mubr.bf16.gmra.mxu1 %v500_v21  ;;  %1694 = vmatprep.subr.bf16.mxu0 %v1825_v25 }
 0x109   :  { %v342_v27 = vadd.f32 %v341_v26, %v2049_v43  ;;  %v454_v28 = vmax.f32 %v340_v24, 0.0 }
 0x10a   :  { %v345_v29 = vpop.f32.mrf.mxu0 }
 0x10b   :  { %v455_v31 = vmax.f32 %v342_v27, 0.0  ;;  %v502_v35 = vpack.c.bf16 %v454_v28, %v452_v32  ;;  %v346_v39 = vadd.f32 %v345_v29, %v2051_v44  ;;  %1695 = vmatpush3.bf16.msra.mxu0 %v1825_v25 }
 0x10c   :  { %v347_v33 = vpop.f32.mrf.mxu0 }
 0x10d   :  { %v503_v34 = vpack.c.bf16 %v455_v31, %v453_v30  ;;  %v348_v37 = vadd.f32 %v347_v33, %v2049_v43  ;;  %v456_v48 = vmax.f32 %v346_v39, 0.0 }
 0x10e   :  { %v349_v36 = vpop.f32.mrf.mxu0 }
 0x10f   :  { %v350_v38 = vadd.f32 %v349_v36, %v2051_v44  ;;  %743 = vmatprep.mubr.bf16.mxu1 %v503_v34  ;;  %v457_v46 = vmax.f32 %v348_v37, 0.0 }
 0x110   :  { %v351_v40 = vpop.f32.mrf.mxu0  ;;  %744 = vmatmul.mubr.bf16.gmra.mxu1 %v502_v35 }
 0x111   :  { %v352_v41 = vadd.f32 %v351_v40, %v2049_v43  ;;  %v458_v42 = vmax.f32 %v350_v38, 0.0 }
 0x112   :  { %v355_v45 = vpop.f32.mrf.mxu0 }
 0x113   :  { %v459_v47 = vmax.f32 %v352_v41, 0.0  ;;  %v504_v51 = vpack.c.bf16 %v458_v42, %v456_v48  ;;  %v356_v55 = vadd.f32 %v355_v45, %v2051_v44 }
 0x114   :  { %v357_v49 = vpop.f32.mrf.mxu0 }
 0x115   :  { %v505_v50 = vpack.c.bf16 %v459_v47, %v457_v46  ;;  %v358_v53 = vadd.f32 %v357_v49, %v2049_v43  ;;  %v460_v62 = vmax.f32 %v356_v55, 0.0 }
 0x116   :  { %v359_v52 = vpop.f32.mrf.mxu0 }
 0x117   :  { %v360_v54 = vadd.f32 %v359_v52, %v2051_v44  ;;  %751 = vmatprep.mubr.bf16.mxu1 %v505_v50  ;;  %v461_v60 = vmax.f32 %v358_v53, 0.0 }
 0x118   :  { %v361_v56 = vpop.f32.mrf.mxu0  ;;  %752 = vmatmul.mubr.bf16.gmra.mxu1 %v504_v51 }
 0x119   :  { %v362_v57 = vadd.f32 %v361_v56, %v2049_v43  ;;  %v462_v58 = vmax.f32 %v360_v54, 0.0 }
 0x11a   :  { %v365_v59 = vpop.f32.mrf.mxu0 }
 0x11b   :  { %v463_v61 = vmax.f32 %v362_v57, 0.0  ;;  %v506_v2 = vpack.c.bf16 %v462_v58, %v460_v62  ;;  %v366_v6 = vadd.f32 %v365_v59, %v2051_v44 }
 0x11c   :  { %v367_v63 = vpop.f32.mrf.mxu0 }
 0x11d   :  { %v507_v0 = vpack.c.bf16 %v463_v61, %v461_v60  ;;  %v368_v4 = vadd.f32 %v367_v63, %v2049_v43  ;;  %v464_v14 = vmax.f32 %v366_v6, 0.0 }
 0x11e   :  { %v369_v3 = vpop.f32.mrf.mxu0 }
 0x11f   :  { %v370_v5 = vadd.f32 %v369_v3, %v2051_v44  ;;  %759 = vmatprep.mubr.bf16.mxu1 %v507_v0  ;;  %v465_v12 = vmax.f32 %v368_v4, 0.0 }
 0x120   :  { %v371_v7 = vpop.f32.mrf.mxu0  ;;  %760 = vmatmul.mubr.bf16.gmra.mxu1 %v506_v2 }
 0x121   :  { %v372_v8 = vadd.f32 %v371_v7, %v2049_v43  ;;  %v466_v10 = vmax.f32 %v370_v5, 0.0 }
 0x122   :  { %v375_v11 = vpop.f32.mrf.mxu0 }
 0x123   :  { %v467_v13 = vmax.f32 %v372_v8, 0.0  ;;  %v508_v18 = vpack.c.bf16 %v466_v10, %v464_v14  ;;  %v376_v22 = vadd.f32 %v375_v11, %v2051_v44 }
 0x124   :  { %v377_v15 = vpop.f32.mrf.mxu0 }
 0x125   :  { %v509_v16 = vpack.c.bf16 %v467_v13, %v465_v12  ;;  %v378_v20 = vadd.f32 %v377_v15, %v2049_v43  ;;  %v468_v30 = vmax.f32 %v376_v22, 0.0 }
 0x126   :  { %v379_v19 = vpop.f32.mrf.mxu0 }
 0x127   :  { %v380_v21 = vadd.f32 %v379_v19, %v2051_v44  ;;  %767 = vmatprep.mubr.bf16.mxu1 %v509_v16  ;;  %v469_v28 = vmax.f32 %v378_v20, 0.0 }
 0x128   :  { %v381_v23 = vpop.f32.mrf.mxu0  ;;  %768 = vmatmul.mubr.bf16.gmra.mxu1 %v508_v18 }
 0x129   :  { %v382_v24 = vadd.f32 %v381_v23, %v2049_v43  ;;  %v470_v26 = vmax.f32 %v380_v21, 0.0 }
 0x12a   :  { %v385_v27 = vpop.f32.mrf.mxu0 }
 0x12b   :  { %v471_v29 = vmax.f32 %v382_v24, 0.0  ;;  %v510_v33 = vpack.c.bf16 %v470_v26, %v468_v30  ;;  %v386_v37 = vadd.f32 %v385_v27, %v2051_v44 }
 0x12c   :  { %v387_v31 = vpop.f32.mrf.mxu0 }
 0x12d   :  { %v511_v32 = vpack.c.bf16 %v471_v29, %v469_v28  ;;  %v388_v35 = vadd.f32 %v387_v31, %v2049_v43  ;;  %v472_v46 = vmax.f32 %v386_v37, 0.0  ;;  %v2144_v29 = vld [vmem:[%s2287_s4] ss:$0 sm:$0xff] }
 0x12e   :  { %v389_v34 = vpop.f32.mrf.mxu0 }
 0x12f   :  { %v390_v36 = vadd.f32 %v389_v34, %v2051_v44  ;;  %775 = vmatprep.mubr.bf16.mxu1 %v511_v32  ;;  %v473_v42 = vmax.f32 %v388_v35, 0.0  ;;  %v1826_v32 = vld [vmem:[%s2290_s7 + $0x18] sm:$0xff]   ;;  %v1827_v35 = vld [vmem:[%s2290_s7 + $0x10] sm:$0xff]  }
 0x130   :  { %v391_v38 = vpop.f32.mrf.mxu0  ;;  %776 = vmatmul.mubr.bf16.gmra.mxu1 %v510_v33  ;;  %1768 = vmatprep.subr.bf16.mxu1 %v1826_v32 }
 0x131   :  { %v392_v39 = vadd.f32 %v391_v38, %v2049_v43  ;;  %v474_v40 = vmax.f32 %v390_v36, 0.0  ;;  %1728 = vmatprep.subr.bf16.mxu0 %v1826_v32  ;;  %1772 = vmatpush3.bf16.msra.mxu1 %v1826_v32 }
 0x132   :  { %v395_v41 = vpop.f32.mrf.mxu0  ;;  %1769 = vmatprep.subr.bf16.mxu1 %v1827_v35 }
 0x133   :  { %v475_v45 = vmax.f32 %v392_v39, 0.0  ;;  %v512_v49 = vpack.c.bf16 %v474_v40, %v472_v46  ;;  %v396_v53 = vadd.f32 %v395_v41, %v2051_v44 }
 0x134   :  { %v397_v47 = vpop.f32.mrf.mxu0 }
 0x135   :  { %v513_v48 = vpack.c.bf16 %v475_v45, %v473_v42  ;;  %v398_v51 = vadd.f32 %v397_v47, %v2049_v43  ;;  %v476_v60 = vmax.f32 %v396_v53, 0.0  ;;  %1773 = vmatpush3.bf16.msra.mxu1 %v1827_v35 }
 0x136   :  { %v399_v50 = vpop.f32.mrf.mxu0 }
 0x137   :  { %v400_v52 = vadd.f32 %v399_v50, %v2051_v44  ;;  %783 = vmatprep.mubr.bf16.mxu1 %v513_v48  ;;  %v477_v58 = vmax.f32 %v398_v51, 0.0 }
 0x138   :  { %v401_v54 = vpop.f32.mrf.mxu0  ;;  %784 = vmatmul.mubr.bf16.gmra.mxu1 %v512_v49 }
 0x139   :  { %v402_v55 = vadd.f32 %v401_v54, %v2049_v43  ;;  %v478_v56 = vmax.f32 %v400_v52, 0.0 }
 0x13a   :  { %v405_v57 = vpop.f32.mrf.mxu0 }
 0x13b   :  { %v479_v59 = vmax.f32 %v402_v55, 0.0  ;;  %v514_v63 = vpack.c.bf16 %v478_v56, %v476_v60  ;;  %v406_v3 = vadd.f32 %v405_v57, %v2051_v44 }
 0x13c   :  { %v407_v61 = vpop.f32.mrf.mxu0 }
 0x13d   :  { %v515_v62 = vpack.c.bf16 %v479_v59, %v477_v58  ;;  %v408_v1 = vadd.f32 %v407_v61, %v2049_v43  ;;  %v480_v10 = vmax.f32 %v406_v3, 0.0 }
 0x13e   :  { %v409_v0 = vpop.f32.mrf.mxu0 }
 0x13f   :  { %v410_v2 = vadd.f32 %v409_v0, %v2051_v44  ;;  %791 = vmatprep.mubr.bf16.mxu1 %v515_v62  ;;  %v481_v8 = vmax.f32 %v408_v1, 0.0 }
 0x140   :  { %v411_v4 = vpop.f32.mrf.mxu0  ;;  %792 = vmatmul.mubr.bf16.gmra.mxu1 %v514_v63 }
 0x141   :  { %v412_v5 = vadd.f32 %v411_v4, %v2049_v43  ;;  %v482_v6 = vmax.f32 %v410_v2, 0.0 }
 0x142   :  { %v415_v7 = vpop.f32.mrf.mxu0 }
 0x143   :  { %v483_v9 = vmax.f32 %v412_v5, 0.0  ;;  %v516_v13 = vpack.c.bf16 %v482_v6, %v480_v10  ;;  %v416_v17 = vadd.f32 %v415_v7, %v2051_v44 }
 0x144   :  { %v417_v11 = vpop.f32.mrf.mxu0 }
 0x145   :  { %v517_v12 = vpack.c.bf16 %v483_v9, %v481_v8  ;;  %v418_v15 = vadd.f32 %v417_v11, %v2049_v43  ;;  %v484_v23 = vmax.f32 %v416_v17, 0.0 }
 0x146   :  { %v419_v14 = vpop.f32.mrf.mxu0 }
 0x147   :  { %v420_v16 = vadd.f32 %v419_v14, %v2051_v44  ;;  %799 = vmatprep.mubr.bf16.mxu1 %v517_v12  ;;  %v485_v21 = vmax.f32 %v418_v15, 0.0 }
 0x148   :  { %v421_v18 = vpop.f32.mrf.mxu0  ;;  %800 = vmatmul.mubr.bf16.gmra.mxu1 %v516_v13 }
 0x149   :  { %v422_v19 = vadd.f32 %v421_v18, %v2049_v43  ;;  %v486_v20 = vmax.f32 %v420_v16, 0.0 }
 0x14b   :  { %v487_v22 = vmax.f32 %v422_v19, 0.0  ;;  %v518_v25 = vpack.c.bf16 %v486_v20, %v484_v23 }
 0x14d   :  { %v519_v24 = vpack.c.bf16 %v487_v22, %v485_v21 }
 0x14f   :  { %807 = vmatprep.mubr.bf16.mxu1 %v519_v24 }
 0x150   :  { %808 = vmatmul.mubr.bf16.gmra.mxu1 %v518_v25 }
 0x198   :  { %v1540_v26 = vpop.f32.mrf.mxu1 }
 0x19a   :  { %v1541_v27 = vpop.f32.mrf.mxu1 }
 0x19b   :  { %v1542_v28 = vadd.f32 %v1541_v27, %v1540_v26 }
 0x19c   :  { %v1543_v44 = vpop.f32.mrf.mxu1 }
 0x19d   :  { %v690_v43 = vadd.f32 %v1542_v28, %v2144_v29 }
 0x19e   :  { %v1544_v30 = vpop.f32.mrf.mxu1 }
 0x19f   :  { %v1545_v31 = vadd.f32 %v1544_v30, %v1543_v44  ;;  %v816_v37 = vmax.f32 %v690_v43, 0.0 }
 0x1a0   :  { %v1546_v33 = vpop.f32.mrf.mxu1 }
 0x1a1   :  { %v693_v34 = vadd.f32 %v1545_v31, %v2144_v29 }
 0x1a2   :  { %v1547_v36 = vpop.f32.mrf.mxu1 }
 0x1a3   :  { %v817_v38 = vmax.f32 %v693_v34, 0.0  ;;  %v1548_v39 = vadd.f32 %v1547_v36, %v1546_v33 }
 0x1a4   :  { %v1549_v40 = vpop.f32.mrf.mxu1 }
 0x1a5   :  { %v848_v41 = vpack.c.bf16 %v817_v38, %v816_v37  ;;  %v698_v45 = vadd.f32 %v1548_v39, %v2144_v29 }
 0x1a6   :  { %v1550_v42 = vpop.f32.mrf.mxu1 }
 0x1a7   :  { %v1551_v46 = vadd.f32 %v1550_v42, %v1549_v40  ;;  %1696 = vmatprep.mubr.bf16.mxu0 %v848_v41  ;;  %v818_v50 = vmax.f32 %v698_v45, 0.0 }
 0x1a8   :  { %v1552_v47 = vpop.f32.mrf.mxu1 }
 0x1a9   :  { %v701_v48 = vadd.f32 %v1551_v46, %v2144_v29 }
 0x1aa   :  { %v1553_v49 = vpop.f32.mrf.mxu1 }
 0x1ab   :  { %v819_v51 = vmax.f32 %v701_v48, 0.0  ;;  %v1554_v52 = vadd.f32 %v1553_v49, %v1552_v47 }
 0x1ac   :  { %v1555_v53 = vpop.f32.mrf.mxu1 }
 0x1ad   :  { %v849_v54 = vpack.c.bf16 %v819_v51, %v818_v50  ;;  %v706_v56 = vadd.f32 %v1554_v52, %v2144_v29 }
 0x1ae   :  { %v1556_v55 = vpop.f32.mrf.mxu1 }
 0x1af   :  { %v1557_v57 = vadd.f32 %v1556_v55, %v1555_v53  ;;  %1697 = vmatmul.mubr.bf16.vlgmr.msra.gmra.mxu0 %v849_v54  ;;  %v820_v61 = vmax.f32 %v706_v56, 0.0 }
 0x1b0   :  { %v1558_v58 = vpop.f32.mrf.mxu1  ;;  %1729 = vmatpush3.bf16.msra.mxu0 %v1826_v32 }
 0x1b1   :  { %v709_v59 = vadd.f32 %v1557_v57, %v2144_v29  ;;  %1730 = vmatprep.subr.bf16.mxu0 %v1827_v35 }
 0x1b2   :  { %v1559_v60 = vpop.f32.mrf.mxu1 }
 0x1b3   :  { %v821_v62 = vmax.f32 %v709_v59, 0.0  ;;  %v1560_v63 = vadd.f32 %v1559_v60, %v1558_v58 }
 0x1b4   :  { %v1561_v0 = vpop.f32.mrf.mxu1  ;;  %1731 = vmatpush3.bf16.msra.mxu0 %v1827_v35 }
 0x1b5   :  { %v850_v1 = vpack.c.bf16 %v821_v62, %v820_v61  ;;  %v714_v3 = vadd.f32 %v1560_v63, %v2144_v29 }
 0x1b6   :  { %v1562_v2 = vpop.f32.mrf.mxu1 }
 0x1b7   :  { %v1563_v4 = vadd.f32 %v1562_v2, %v1561_v0  ;;  %1700 = vmatprep.mubr.bf16.mxu0 %v850_v1  ;;  %v822_v8 = vmax.f32 %v714_v3, 0.0 }
 0x1b8   :  { %v1564_v5 = vpop.f32.mrf.mxu1 }
 0x1b9   :  { %v717_v6 = vadd.f32 %v1563_v4, %v2144_v29 }
 0x1ba   :  { %v1565_v7 = vpop.f32.mrf.mxu1 }
 0x1bb   :  { %v823_v9 = vmax.f32 %v717_v6, 0.0  ;;  %v1566_v10 = vadd.f32 %v1565_v7, %v1564_v5 }
 0x1bc   :  { %v1567_v11 = vpop.f32.mrf.mxu1 }
 0x1bd   :  { %v851_v12 = vpack.c.bf16 %v823_v9, %v822_v8  ;;  %v722_v14 = vadd.f32 %v1566_v10, %v2144_v29 }
 0x1be   :  { %v1568_v13 = vpop.f32.mrf.mxu1 }
 0x1bf   :  { %v1569_v15 = vadd.f32 %v1568_v13, %v1567_v11  ;;  %1701 = vmatmul.mubr.bf16.gmra.mxu0 %v851_v12  ;;  %v824_v19 = vmax.f32 %v722_v14, 0.0 }
 0x1c0   :  { %v1570_v16 = vpop.f32.mrf.mxu1 }
 0x1c1   :  { %v725_v17 = vadd.f32 %v1569_v15, %v2144_v29 }
 0x1c2   :  { %v1571_v18 = vpop.f32.mrf.mxu1 }
 0x1c3   :  { %v825_v20 = vmax.f32 %v725_v17, 0.0  ;;  %v1572_v21 = vadd.f32 %v1571_v18, %v1570_v16 }
 0x1c4   :  { %v1573_v22 = vpop.f32.mrf.mxu1 }
 0x1c5   :  { %v852_v23 = vpack.c.bf16 %v825_v20, %v824_v19  ;;  %v730_v25 = vadd.f32 %v1572_v21, %v2144_v29 }
 0x1c6   :  { %v1574_v24 = vpop.f32.mrf.mxu1 }
 0x1c7   :  { %v1575_v26 = vadd.f32 %v1574_v24, %v1573_v22  ;;  %1704 = vmatprep.mubr.bf16.mxu0 %v852_v23  ;;  %v826_v30 = vmax.f32 %v730_v25, 0.0  ;;  %v1828_v25 = vld [vmem:[%s2290_s7 + $0x8] sm:$0xff]  }
 0x1c8   :  { %v1576_v27 = vpop.f32.mrf.mxu1  ;;  %1732 = vmatprep.subr.bf16.mxu0 %v1828_v25  ;;  %1770 = vmatprep.subr.bf16.mxu1 %v1828_v25 }
 0x1c9   :  { %v733_v28 = vadd.f32 %v1575_v26, %v2144_v29  ;;  %1733 = vmatpush3.bf16.msra.mxu0 %v1828_v25  ;;  %1774 = vmatpush3.bf16.msra.mxu1 %v1828_v25 }
 0x1ca   :  { %v1577_v44 = vpop.f32.mrf.mxu1 }
 0x1cb   :  { %v827_v43 = vmax.f32 %v733_v28, 0.0  ;;  %v1578_v31 = vadd.f32 %v1577_v44, %v1576_v27 }
 0x1cc   :  { %v1579_v32 = vpop.f32.mrf.mxu1 }
 0x1cd   :  { %v853_v33 = vpack.c.bf16 %v827_v43, %v826_v30  ;;  %v738_v35 = vadd.f32 %v1578_v31, %v2144_v29  ;;  %v1829_v43 = vld [vmem:[%s2290_s7] sm:$0xff]  }
 0x1ce   :  { %v1580_v34 = vpop.f32.mrf.mxu1  ;;  %1734 = vmatprep.subr.bf16.mxu0 %v1829_v43  ;;  %1771 = vmatprep.subr.bf16.mxu1 %v1829_v43 }
 0x1cf   :  { %v1581_v36 = vadd.f32 %v1580_v34, %v1579_v32  ;;  %1705 = vmatmul.mubr.bf16.gmra.mxu0 %v853_v33  ;;  %v828_v40 = vmax.f32 %v738_v35, 0.0  ;;  %1775 = vmatpush3.bf16.msra.mxu1 %v1829_v43 }
 0x1d0   :  { %v1582_v37 = vpop.f32.mrf.mxu1  ;;  %1735 = vmatpush3.bf16.msra.mxu0 %v1829_v43 }
 0x1d1   :  { %v741_v38 = vadd.f32 %v1581_v36, %v2144_v29 }
 0x1d2   :  { %v1583_v39 = vpop.f32.mrf.mxu1 }
 0x1d3   :  { %v829_v41 = vmax.f32 %v741_v38, 0.0  ;;  %v1584_v42 = vadd.f32 %v1583_v39, %v1582_v37 }
 0x1d4   :  { %v1585_v45 = vpop.f32.mrf.mxu1 }
 0x1d5   :  { %v854_v46 = vpack.c.bf16 %v829_v41, %v828_v40  ;;  %v746_v48 = vadd.f32 %v1584_v42, %v2144_v29 }
 0x1d6   :  { %v1586_v47 = vpop.f32.mrf.mxu1 }
 0x1d7   :  { %v1587_v49 = vadd.f32 %v1586_v47, %v1585_v45  ;;  %1708 = vmatprep.mubr.bf16.mxu0 %v854_v46  ;;  %v830_v53 = vmax.f32 %v746_v48, 0.0 }
 0x1d8   :  { %v1588_v50 = vpop.f32.mrf.mxu1 }
 0x1d9   :  { %v749_v51 = vadd.f32 %v1587_v49, %v2144_v29 }
 0x1da   :  { %v1589_v52 = vpop.f32.mrf.mxu1 }
 0x1db   :  { %v831_v54 = vmax.f32 %v749_v51, 0.0  ;;  %v1590_v55 = vadd.f32 %v1589_v52, %v1588_v50 }
 0x1dc   :  { %v1591_v56 = vpop.f32.mrf.mxu1 }
 0x1dd   :  { %v855_v57 = vpack.c.bf16 %v831_v54, %v830_v53  ;;  %v754_v59 = vadd.f32 %v1590_v55, %v2144_v29 }
 0x1de   :  { %v1592_v58 = vpop.f32.mrf.mxu1 }
 0x1df   :  { %v1593_v60 = vadd.f32 %v1592_v58, %v1591_v56  ;;  %1709 = vmatmul.mubr.bf16.gmra.mxu0 %v855_v57  ;;  %v832_v0 = vmax.f32 %v754_v59, 0.0 }
 0x1e0   :  { %v1594_v61 = vpop.f32.mrf.mxu1 }
 0x1e1   :  { %v757_v62 = vadd.f32 %v1593_v60, %v2144_v29 }
 0x1e2   :  { %v1595_v63 = vpop.f32.mrf.mxu1 }
 0x1e3   :  { %v833_v1 = vmax.f32 %v757_v62, 0.0  ;;  %v1596_v2 = vadd.f32 %v1595_v63, %v1594_v61 }
 0x1e4   :  { %v1597_v3 = vpop.f32.mrf.mxu1 }
 0x1e5   :  { %v856_v4 = vpack.c.bf16 %v833_v1, %v832_v0  ;;  %v762_v6 = vadd.f32 %v1596_v2, %v2144_v29 }
 0x1e6   :  { %v1598_v5 = vpop.f32.mrf.mxu1 }
 0x1e7   :  { %v1599_v7 = vadd.f32 %v1598_v5, %v1597_v3  ;;  %1712 = vmatprep.mubr.bf16.mxu0 %v856_v4  ;;  %v834_v11 = vmax.f32 %v762_v6, 0.0 }
 0x1e8   :  { %v1600_v8 = vpop.f32.mrf.mxu1 }
 0x1e9   :  { %v765_v9 = vadd.f32 %v1599_v7, %v2144_v29 }
 0x1ea   :  { %v1601_v10 = vpop.f32.mrf.mxu1 }
 0x1eb   :  { %v835_v12 = vmax.f32 %v765_v9, 0.0  ;;  %v1602_v13 = vadd.f32 %v1601_v10, %v1600_v8 }
 0x1ec   :  { %v1603_v14 = vpop.f32.mrf.mxu1 }
 0x1ed   :  { %v857_v15 = vpack.c.bf16 %v835_v12, %v834_v11  ;;  %v770_v17 = vadd.f32 %v1602_v13, %v2144_v29 }
 0x1ee   :  { %v1604_v16 = vpop.f32.mrf.mxu1 }
 0x1ef   :  { %v1605_v18 = vadd.f32 %v1604_v16, %v1603_v14  ;;  %1713 = vmatmul.mubr.bf16.gmra.mxu0 %v857_v15  ;;  %v836_v22 = vmax.f32 %v770_v17, 0.0 }
 0x1f0   :  { %v1606_v19 = vpop.f32.mrf.mxu1 }
 0x1f1   :  { %v773_v20 = vadd.f32 %v1605_v18, %v2144_v29 }
 0x1f2   :  { %v1607_v21 = vpop.f32.mrf.mxu1 }
 0x1f3   :  { %v837_v23 = vmax.f32 %v773_v20, 0.0  ;;  %v1608_v24 = vadd.f32 %v1607_v21, %v1606_v19  ;;  %v2193_v19 = vld [vmem:[%s2289_s6] ss:$0 sm:$0xff] }
 0x1f4   :  { %v1609_v26 = vpop.f32.mrf.mxu1 }
 0x1f5   :  { %v858_v27 = vpack.c.bf16 %v837_v23, %v836_v22  ;;  %v778_v44 = vadd.f32 %v1608_v24, %v2144_v29 }
 0x1f6   :  { %v1610_v28 = vpop.f32.mrf.mxu1 }
 0x1f7   :  { %v1611_v30 = vadd.f32 %v1610_v28, %v1609_v26  ;;  %1716 = vmatprep.mubr.bf16.mxu0 %v858_v27  ;;  %v838_v34 = vmax.f32 %v778_v44, 0.0 }
 0x1f8   :  { %v1612_v31 = vpop.f32.mrf.mxu1 }
 0x1f9   :  { %v781_v32 = vadd.f32 %v1611_v30, %v2144_v29 }
 0x1fa   :  { %v1613_v33 = vpop.f32.mrf.mxu1 }
 0x1fb   :  { %v839_v35 = vmax.f32 %v781_v32, 0.0  ;;  %v1614_v36 = vadd.f32 %v1613_v33, %v1612_v31 }
 0x1fc   :  { %v1615_v37 = vpop.f32.mrf.mxu1 }
 0x1fd   :  { %v859_v38 = vpack.c.bf16 %v839_v35, %v838_v34  ;;  %v786_v40 = vadd.f32 %v1614_v36, %v2144_v29 }
 0x1fe   :  { %v1616_v39 = vpop.f32.mrf.mxu1 }
 0x1ff   :  { %v1617_v41 = vadd.f32 %v1616_v39, %v1615_v37  ;;  %1717 = vmatmul.mubr.bf16.gmra.mxu0 %v859_v38  ;;  %v840_v47 = vmax.f32 %v786_v40, 0.0 }
 0x200   :  { %v1618_v42 = vpop.f32.mrf.mxu1 }
 0x201   :  { %v789_v45 = vadd.f32 %v1617_v41, %v2144_v29 }
 0x202   :  { %v1619_v46 = vpop.f32.mrf.mxu1 }
 0x203   :  { %v841_v48 = vmax.f32 %v789_v45, 0.0  ;;  %v1620_v49 = vadd.f32 %v1619_v46, %v1618_v42 }
 0x204   :  { %v1621_v50 = vpop.f32.mrf.mxu1 }
 0x205   :  { %v860_v51 = vpack.c.bf16 %v841_v48, %v840_v47  ;;  %v794_v53 = vadd.f32 %v1620_v49, %v2144_v29 }
 0x206   :  { %v1622_v52 = vpop.f32.mrf.mxu1 }
 0x207   :  { %v1623_v54 = vadd.f32 %v1622_v52, %v1621_v50  ;;  %1720 = vmatprep.mubr.bf16.mxu0 %v860_v51  ;;  %v842_v58 = vmax.f32 %v794_v53, 0.0 }
 0x208   :  { %v1624_v55 = vpop.f32.mrf.mxu1 }
 0x209   :  { %v797_v56 = vadd.f32 %v1623_v54, %v2144_v29 }
 0x20a   :  { %v1625_v57 = vpop.f32.mrf.mxu1 }
 0x20b   :  { %v843_v59 = vmax.f32 %v797_v56, 0.0  ;;  %v1626_v60 = vadd.f32 %v1625_v57, %v1624_v55 }
 0x20c   :  { %v1627_v61 = vpop.f32.mrf.mxu1 }
 0x20d   :  { %v861_v62 = vpack.c.bf16 %v843_v59, %v842_v58  ;;  %v802_v0 = vadd.f32 %v1626_v60, %v2144_v29 }
 0x20e   :  { %v1628_v63 = vpop.f32.mrf.mxu1 }
 0x20f   :  { %v1629_v1 = vadd.f32 %v1628_v63, %v1627_v61  ;;  %1721 = vmatmul.mubr.bf16.gmra.mxu0 %v861_v62  ;;  %v844_v5 = vmax.f32 %v802_v0, 0.0 }
 0x210   :  { %v1630_v2 = vpop.f32.mrf.mxu1 }
 0x211   :  { %v805_v3 = vadd.f32 %v1629_v1, %v2144_v29 }
 0x212   :  { %v1631_v4 = vpop.f32.mrf.mxu1 }
 0x213   :  { %v845_v6 = vmax.f32 %v805_v3, 0.0  ;;  %v1632_v7 = vadd.f32 %v1631_v4, %v1630_v2 }
 0x214   :  { %v1633_v8 = vpop.f32.mrf.mxu1 }
 0x215   :  { %v862_v9 = vpack.c.bf16 %v845_v6, %v844_v5  ;;  %v810_v11 = vadd.f32 %v1632_v7, %v2144_v29 }
 0x216   :  { %v1634_v10 = vpop.f32.mrf.mxu1 }
 0x217   :  { %v1635_v12 = vadd.f32 %v1634_v10, %v1633_v8  ;;  %1724 = vmatprep.mubr.bf16.mxu0 %v862_v9  ;;  %v846_v14 = vmax.f32 %v810_v11, 0.0 }
 0x219   :  { %v813_v13 = vadd.f32 %v1635_v12, %v2144_v29 }
 0x21b   :  { %v847_v15 = vmax.f32 %v813_v13, 0.0 }
 0x21d   :  { %v863_v16 = vpack.c.bf16 %v847_v15, %v846_v14 }
 0x21f   :  { %1725 = vmatmul.mubr.bf16.gmra.mxu0 %v863_v16 }
 0x26f   :  { %v1698_v17 = vpop.f32.mrf.mxu0 }
 0x270   :  { %v978_v23 = vadd.f32 %v1698_v17, %v2193_v19 }
 0x271   :  { %v969_v18 = vpop.f32.mrf.mxu0 }
 0x272   :  { %v970_v21 = vadd.f32 %v2193_v19, %v969_v18  ;;  %v1098_v28 = vmax.f32 %v978_v23, 0.0 }
 0x273   :  { %v1699_v20 = vpop.f32.mrf.mxu0 }
 0x274   :  { %v981_v22 = vadd.f32 %v1699_v20, %v2193_v19  ;;  %v1096_v26 = vmax.f32 %v970_v21, 0.0 }
 0x275   :  { %v972_v24 = vpop.f32.mrf.mxu0 }
 0x276   :  { %v973_v29 = vadd.f32 %v2193_v19, %v972_v24  ;;  %v1099_v25 = vmax.f32 %v981_v22, 0.0 }
 0x278   :  { %v1097_v27 = vmax.f32 %v973_v29, 0.0  ;;  %v1129_v30 = vpack.c.bf16 %v1099_v25, %v1098_v28 }
 0x27a   :  { %v1128_v44 = vpack.c.bf16 %v1097_v27, %v1096_v26 }
 0x27c   :  { %1736 = vmatprep.mubr.msk.bf16.mxu0 %vm1183_vm1, %v1128_v44 }
 0x27d   :  { %1737 = vmatmul.mubr.msk.bf16.vlgmr.msra.gmra.mxu0 %vm1183_vm1, %v1129_v30 }
 0x27f   :  { %v1702_v43 = vpop.f32.mrf.mxu0 }
 0x280   :  { %v994_v35 = vadd.f32 %v1702_v43, %v2193_v19 }
 0x281   :  { %v985_v31 = vpop.f32.mrf.mxu0 }
 0x282   :  { %v986_v33 = vadd.f32 %v2193_v19, %v985_v31  ;;  %v1102_v41 = vmax.f32 %v994_v35, 0.0 }
 0x283   :  { %v1703_v32 = vpop.f32.mrf.mxu0 }
 0x284   :  { %v997_v34 = vadd.f32 %v1703_v32, %v2193_v19  ;;  %v1100_v39 = vmax.f32 %v986_v33, 0.0 }
 0x285   :  { %v988_v36 = vpop.f32.mrf.mxu0 }
 0x286   :  { %v989_v37 = vadd.f32 %v2193_v19, %v988_v36  ;;  %v1103_v38 = vmax.f32 %v997_v34, 0.0 }
 0x288   :  { %v1101_v40 = vmax.f32 %v989_v37, 0.0  ;;  %v1131_v45 = vpack.c.bf16 %v1103_v38, %v1102_v41 }
 0x28a   :  { %v1130_v42 = vpack.c.bf16 %v1101_v40, %v1100_v39 }
 0x28c   :  { %1740 = vmatprep.mubr.msk.bf16.mxu1 %vm1183_vm1, %v1130_v42 }
 0x28d   :  { %1741 = vmatmul.mubr.msk.bf16.vlgmr.msra.gmra.mxu1 %vm1183_vm1, %v1131_v45 }
 0x28f   :  { %v1706_v46 = vpop.f32.mrf.mxu0 }
 0x290   :  { %v1010_v51 = vadd.f32 %v1706_v46, %v2193_v19 }
 0x291   :  { %v1001_v47 = vpop.f32.mrf.mxu0 }
 0x292   :  { %v1002_v49 = vadd.f32 %v2193_v19, %v1001_v47  ;;  %v1106_v57 = vmax.f32 %v1010_v51, 0.0 }
 0x293   :  { %v1707_v48 = vpop.f32.mrf.mxu0 }
 0x294   :  { %v1013_v50 = vadd.f32 %v1707_v48, %v2193_v19  ;;  %v1104_v55 = vmax.f32 %v1002_v49, 0.0 }
 0x295   :  { %v1004_v52 = vpop.f32.mrf.mxu0 }
 0x296   :  { %v1005_v53 = vadd.f32 %v2193_v19, %v1004_v52  ;;  %v1107_v54 = vmax.f32 %v1013_v50, 0.0 }
 0x298   :  { %v1105_v56 = vmax.f32 %v1005_v53, 0.0  ;;  %v1133_v59 = vpack.c.bf16 %v1107_v54, %v1106_v57 }
 0x29a   :  { %v1132_v58 = vpack.c.bf16 %v1105_v56, %v1104_v55 }
 0x29c   :  { %1744 = vmatprep.mubr.msk.bf16.mxu1 %vm1183_vm1, %v1132_v58 }
 0x29d   :  { %1745 = vmatmul.mubr.msk.bf16.gmra.mxu1 %vm1183_vm1, %v1133_v59 }
 0x29f   :  { %v1710_v60 = vpop.f32.mrf.mxu0 }
 0x2a0   :  { %v1026_v1 = vadd.f32 %v1710_v60, %v2193_v19 }
 0x2a1   :  { %v1017_v61 = vpop.f32.mrf.mxu0 }
 0x2a2   :  { %v1018_v63 = vadd.f32 %v2193_v19, %v1017_v61  ;;  %v1110_v7 = vmax.f32 %v1026_v1, 0.0 }
 0x2a3   :  { %v1711_v62 = vpop.f32.mrf.mxu0 }
 0x2a4   :  { %v1029_v0 = vadd.f32 %v1711_v62, %v2193_v19  ;;  %v1108_v5 = vmax.f32 %v1018_v63, 0.0 }
 0x2a5   :  { %v1020_v2 = vpop.f32.mrf.mxu0 }
 0x2a6   :  { %v1021_v3 = vadd.f32 %v2193_v19, %v1020_v2  ;;  %v1111_v4 = vmax.f32 %v1029_v0, 0.0 }
 0x2a8   :  { %v1109_v6 = vmax.f32 %v1021_v3, 0.0  ;;  %v1135_v9 = vpack.c.bf16 %v1111_v4, %v1110_v7  ;;  %v2246_v3 = vld [vmem:[%s2291_s8] ss:$0 sm:$0xff]  ;;  %s1853_s8 = smov [#allocation2]  }
 0x2a9   :  { %s1430_s16 = sshll.u32 %s1853_s8, 4  ;;  %s1431_s16 = int_to_ptr.vmem [resolvable:$true] %s1430_s16 }
 0x2aa   :  { %v1134_v8 = vpack.c.bf16 %v1109_v6, %v1108_v5  ;;  %s1830_s17 = scalar_lea.vmem %s1431_s16, 4096  ;;  %p1835_p1 = scmp.lt.s32.totalorder %s1431_s16, %s1431_s16 }
 0x2ab   :  { %p1831_p0 = scmp.ne.s32.totalorder %s1431_s16, %s1830_s17  ;;  %p1836_p2 = scmp.lt.s32.totalorder %s1830_s17, %s1830_s17 }
 0x2ac   :  { %1748 = vmatprep.mubr.msk.bf16.mxu1 %vm1183_vm1, %v1134_v8 }
 0x2ad   :  { %1749 = vmatmul.mubr.msk.bf16.gmra.mxu1 %vm1183_vm1, %v1135_v9  ;;  %p1837_p3 = por %p1836_p2, %p1835_p1 }
 0x2af   :  { %v1714_v10 = vpop.f32.mrf.mxu0  ;;  %p1838_p4 = pnand %p1837_p3, %p1831_p0 }
 0x2b0   :  { %v1042_v15 = vadd.f32 %v1714_v10, %v2193_v19 }
 0x2b1   :  { %v1033_v11 = vpop.f32.mrf.mxu0 }
 0x2b2   :  { %v1034_v13 = vadd.f32 %v2193_v19, %v1033_v11  ;;  %v1114_v22 = vmax.f32 %v1042_v15, 0.0 }
 0x2b3   :  { %v1715_v12 = vpop.f32.mrf.mxu0 }
 0x2b4   :  { %v1045_v14 = vadd.f32 %v1715_v12, %v2193_v19  ;;  %v1112_v20 = vmax.f32 %v1034_v13, 0.0 }
 0x2b5   :  { %v1036_v16 = vpop.f32.mrf.mxu0 }
 0x2b6   :  { %v1037_v17 = vadd.f32 %v2193_v19, %v1036_v16  ;;  %v1115_v18 = vmax.f32 %v1045_v14, 0.0 }
 0x2b8   :  { %v1113_v21 = vmax.f32 %v1037_v17, 0.0  ;;  %v1137_v24 = vpack.c.bf16 %v1115_v18, %v1114_v22 }
 0x2ba   :  { %v1136_v23 = vpack.c.bf16 %v1113_v21, %v1112_v20 }
 0x2bc   :  { %1752 = vmatprep.mubr.msk.bf16.mxu1 %vm1183_vm1, %v1136_v23 }
 0x2bd   :  { %1753 = vmatmul.mubr.msk.bf16.gmra.mxu1 %vm1183_vm1, %v1137_v24 }
 0x2bf   :  { %v1718_v29 = vpop.f32.mrf.mxu0 }
 0x2c0   :  { %v1058_v44 = vadd.f32 %v1718_v29, %v2193_v19 }
 0x2c1   :  { %v1049_v25 = vpop.f32.mrf.mxu0 }
 0x2c2   :  { %v1050_v27 = vadd.f32 %v2193_v19, %v1049_v25  ;;  %v1118_v34 = vmax.f32 %v1058_v44, 0.0 }
 0x2c3   :  { %v1719_v26 = vpop.f32.mrf.mxu0 }
 0x2c4   :  { %v1061_v28 = vadd.f32 %v1719_v26, %v2193_v19  ;;  %v1116_v32 = vmax.f32 %v1050_v27, 0.0 }
 0x2c5   :  { %v1052_v30 = vpop.f32.mrf.mxu0 }
 0x2c6   :  { %v1053_v43 = vadd.f32 %v2193_v19, %v1052_v30  ;;  %v1119_v31 = vmax.f32 %v1061_v28, 0.0 }
 0x2c8   :  { %v1117_v33 = vmax.f32 %v1053_v43, 0.0  ;;  %v1139_v36 = vpack.c.bf16 %v1119_v31, %v1118_v34 }
 0x2ca   :  { %v1138_v35 = vpack.c.bf16 %v1117_v33, %v1116_v32 }
 0x2cc   :  { %1756 = vmatprep.mubr.msk.bf16.mxu1 %vm1183_vm1, %v1138_v35 }
 0x2cd   :  { %1757 = vmatmul.mubr.msk.bf16.gmra.mxu1 %vm1183_vm1, %v1139_v36 }
 0x2cf   :  { %v1722_v37 = vpop.f32.mrf.mxu0 }
 0x2d0   :  { %v1074_v42 = vadd.f32 %v1722_v37, %v2193_v19 }
 0x2d1   :  { %v1065_v38 = vpop.f32.mrf.mxu0 }
 0x2d2   :  { %v1066_v40 = vadd.f32 %v2193_v19, %v1065_v38  ;;  %v1122_v50 = vmax.f32 %v1074_v42, 0.0 }
 0x2d3   :  { %v1723_v39 = vpop.f32.mrf.mxu0 }
 0x2d4   :  { %v1077_v41 = vadd.f32 %v1723_v39, %v2193_v19  ;;  %v1120_v48 = vmax.f32 %v1066_v40, 0.0 }
 0x2d5   :  { %v1068_v45 = vpop.f32.mrf.mxu0 }
 0x2d6   :  { %v1069_v46 = vadd.f32 %v2193_v19, %v1068_v45  ;;  %v1123_v47 = vmax.f32 %v1077_v41, 0.0 }
 0x2d8   :  { %v1121_v49 = vmax.f32 %v1069_v46, 0.0  ;;  %v1141_v52 = vpack.c.bf16 %v1123_v47, %v1122_v50 }
 0x2da   :  { %v1140_v51 = vpack.c.bf16 %v1121_v49, %v1120_v48 }
 0x2dc   :  { %1760 = vmatprep.mubr.msk.bf16.mxu1 %vm1183_vm1, %v1140_v51 }
 0x2dd   :  { %1761 = vmatmul.mubr.msk.bf16.gmra.mxu1 %vm1183_vm1, %v1141_v52 }
 0x2df   :  { %v1726_v53 = vpop.f32.mrf.mxu0 }
 0x2e0   :  { %v1090_v58 = vadd.f32 %v1726_v53, %v2193_v19 }
 0x2e1   :  { %v1081_v54 = vpop.f32.mrf.mxu0 }
 0x2e2   :  { %v1082_v56 = vadd.f32 %v2193_v19, %v1081_v54  ;;  %v1126_v0 = vmax.f32 %v1090_v58, 0.0 }
 0x2e3   :  { %v1727_v55 = vpop.f32.mrf.mxu0 }
 0x2e4   :  { %v1093_v57 = vadd.f32 %v1727_v55, %v2193_v19  ;;  %v1124_v62 = vmax.f32 %v1082_v56, 0.0 }
 0x2e5   :  { %v1084_v59 = vpop.f32.mrf.mxu0 }
 0x2e6   :  { %v1085_v60 = vadd.f32 %v2193_v19, %v1084_v59  ;;  %v1127_v61 = vmax.f32 %v1093_v57, 0.0 }
 0x2e8   :  { %v1125_v63 = vmax.f32 %v1085_v60, 0.0  ;;  %v1143_v2 = vpack.c.bf16 %v1127_v61, %v1126_v0 }
 0x2ea   :  { %v1142_v1 = vpack.c.bf16 %v1125_v63, %v1124_v62 }
 0x2ec   :  { %1764 = vmatprep.mubr.msk.bf16.mxu1 %vm1183_vm1, %v1142_v1 }
 0x2ed   :  { %1765 = vmatmul.mubr.msk.bf16.gmra.mxu1 %vm1183_vm1, %v1143_v2 }
 0x33d   :  { %v1738_v4 = vpop.f32.mrf.mxu0 }
 0x33e   :  { %v1275_v5 = vadd.f32 %v1738_v4, %v2246_v3 }
 0x33f   :  { %v1266_v6 = vpop.f32.mrf.mxu0 }
 0x340   :  { %1395 = vst [vmem:[#allocation2 + $0x10] sm:$0xff] %v1275_v5  ;;  %v1267_v19 = vadd.f32 %v2246_v3, %v1266_v6 }
 0x341   :  { %v1739_v7 = vpop.f32.mrf.mxu0 }
 0x342   :  { %1393 = vst [vmem:[#allocation2] sm:$0xff] %v1267_v19  ;;  %v1278_v8 = vadd.f32 %v1739_v7, %v2246_v3 }
 0x343   :  { %v1269_v9 = vpop.f32.mrf.mxu0 }
 0x344   :  { %1396 = vst [vmem:[#allocation2 + $0x18] sm:$0xff] %v1278_v8  ;;  %v1270_v10 = vadd.f32 %v2246_v3, %v1269_v9 }
 0x346   :  { %1394 = vst [vmem:[#allocation2 + $0x8] sm:$0xff] %v1270_v10 }
 0x34d   :  { %v1742_v11 = vpop.f32.mrf.mxu1 }
 0x34e   :  { %v1291_v12 = vadd.f32 %v1742_v11, %v2246_v3 }
 0x34f   :  { %v1282_v13 = vpop.f32.mrf.mxu1 }
 0x350   :  { %1399 = vst [vmem:[#allocation2 + $0x30] sm:$0xff] %v1291_v12  ;;  %v1283_v14 = vadd.f32 %v2246_v3, %v1282_v13 }
 0x351   :  { %v1743_v15 = vpop.f32.mrf.mxu1 }
 0x352   :  { %1397 = vst [vmem:[#allocation2 + $0x20] sm:$0xff] %v1283_v14  ;;  %v1294_v16 = vadd.f32 %v1743_v15, %v2246_v3 }
 0x353   :  { %v1285_v17 = vpop.f32.mrf.mxu1 }
 0x354   :  { %1400 = vst [vmem:[#allocation2 + $0x38] sm:$0xff] %v1294_v16  ;;  %v1286_v18 = vadd.f32 %v2246_v3, %v1285_v17 }
 0x356   :  { %1398 = vst [vmem:[#allocation2 + $0x28] sm:$0xff] %v1286_v18 }
 0x35d   :  { %v1746_v20 = vpop.f32.mrf.mxu1 }
 0x35e   :  { %v1307_v21 = vadd.f32 %v1746_v20, %v2246_v3 }
 0x35f   :  { %v1298_v22 = vpop.f32.mrf.mxu1 }
 0x360   :  { %1403 = vst [vmem:[#allocation2 + $0x50] sm:$0xff] %v1307_v21  ;;  %v1299_v23 = vadd.f32 %v2246_v3, %v1298_v22 }
 0x361   :  { %v1747_v24 = vpop.f32.mrf.mxu1 }
 0x362   :  { %1401 = vst [vmem:[#allocation2 + $0x40] sm:$0xff] %v1299_v23  ;;  %v1310_v29 = vadd.f32 %v1747_v24, %v2246_v3 }
 0x363   :  { %v1301_v25 = vpop.f32.mrf.mxu1 }
 0x364   :  { %1404 = vst [vmem:[#allocation2 + $0x58] sm:$0xff] %v1310_v29  ;;  %v1302_v26 = vadd.f32 %v2246_v3, %v1301_v25 }
 0x366   :  { %1402 = vst [vmem:[#allocation2 + $0x48] sm:$0xff] %v1302_v26 }
 0x36d   :  { %v1750_v27 = vpop.f32.mrf.mxu1 }
 0x36e   :  { %v1323_v28 = vadd.f32 %v1750_v27, %v2246_v3 }
 0x36f   :  { %v1314_v44 = vpop.f32.mrf.mxu1 }
 0x370   :  { %1407 = vst [vmem:[#allocation2 + $0x70] sm:$0xff] %v1323_v28  ;;  %v1315_v30 = vadd.f32 %v2246_v3, %v1314_v44 }
 0x371   :  { %v1751_v43 = vpop.f32.mrf.mxu1 }
 0x372   :  { %1405 = vst [vmem:[#allocation2 + $0x60] sm:$0xff] %v1315_v30  ;;  %v1326_v31 = vadd.f32 %v1751_v43, %v2246_v3 }
 0x373   :  { %v1317_v32 = vpop.f32.mrf.mxu1 }
 0x374   :  { %1408 = vst [vmem:[#allocation2 + $0x78] sm:$0xff] %v1326_v31  ;;  %v1318_v33 = vadd.f32 %v2246_v3, %v1317_v32 }
 0x376   :  { %1406 = vst [vmem:[#allocation2 + $0x68] sm:$0xff] %v1318_v33 }
 0x37d   :  { %v1754_v34 = vpop.f32.mrf.mxu1 }
 0x37e   :  { %v1339_v35 = vadd.f32 %v1754_v34, %v2246_v3 }
 0x37f   :  { %v1330_v36 = vpop.f32.mrf.mxu1 }
 0x380   :  { %1411 = vst [vmem:[#allocation2 + $0x90] sm:$0xff] %v1339_v35  ;;  %v1331_v37 = vadd.f32 %v2246_v3, %v1330_v36 }
 0x381   :  { %v1755_v38 = vpop.f32.mrf.mxu1 }
 0x382   :  { %1409 = vst [vmem:[#allocation2 + $0x80] sm:$0xff] %v1331_v37  ;;  %v1342_v39 = vadd.f32 %v1755_v38, %v2246_v3 }
 0x383   :  { %v1333_v40 = vpop.f32.mrf.mxu1 }
 0x384   :  { %1412 = vst [vmem:[#allocation2 + $0x98] sm:$0xff] %v1342_v39  ;;  %v1334_v41 = vadd.f32 %v2246_v3, %v1333_v40 }
 0x386   :  { %1410 = vst [vmem:[#allocation2 + $0x88] sm:$0xff] %v1334_v41 }
 0x38d   :  { %v1758_v42 = vpop.f32.mrf.mxu1 }
 0x38e   :  { %v1355_v45 = vadd.f32 %v1758_v42, %v2246_v3 }
 0x38f   :  { %v1346_v46 = vpop.f32.mrf.mxu1 }
 0x390   :  { %1415 = vst [vmem:[#allocation2 + $0xb0] sm:$0xff] %v1355_v45  ;;  %v1347_v47 = vadd.f32 %v2246_v3, %v1346_v46 }
 0x391   :  { %v1759_v48 = vpop.f32.mrf.mxu1 }
 0x392   :  { %1413 = vst [vmem:[#allocation2 + $0xa0] sm:$0xff] %v1347_v47  ;;  %v1358_v49 = vadd.f32 %v1759_v48, %v2246_v3 }
 0x393   :  { %v1349_v50 = vpop.f32.mrf.mxu1 }
 0x394   :  { %1416 = vst [vmem:[#allocation2 + $0xb8] sm:$0xff] %v1358_v49  ;;  %v1350_v51 = vadd.f32 %v2246_v3, %v1349_v50 }
 0x396   :  { %1414 = vst [vmem:[#allocation2 + $0xa8] sm:$0xff] %v1350_v51 }
 0x39d   :  { %v1762_v52 = vpop.f32.mrf.mxu1 }
 0x39e   :  { %v1371_v53 = vadd.f32 %v1762_v52, %v2246_v3 }
 0x39f   :  { %v1362_v54 = vpop.f32.mrf.mxu1 }
 0x3a0   :  { %1419 = vst [vmem:[#allocation2 + $0xd0] sm:$0xff] %v1371_v53  ;;  %v1363_v55 = vadd.f32 %v2246_v3, %v1362_v54 }
 0x3a1   :  { %v1763_v56 = vpop.f32.mrf.mxu1 }
 0x3a2   :  { %1417 = vst [vmem:[#allocation2 + $0xc0] sm:$0xff] %v1363_v55  ;;  %v1374_v57 = vadd.f32 %v1763_v56, %v2246_v3 }
 0x3a3   :  { %v1365_v58 = vpop.f32.mrf.mxu1 }
 0x3a4   :  { %1420 = vst [vmem:[#allocation2 + $0xd8] sm:$0xff] %v1374_v57  ;;  %v1366_v59 = vadd.f32 %v2246_v3, %v1365_v58 }
 0x3a6   :  { %1418 = vst [vmem:[#allocation2 + $0xc8] sm:$0xff] %v1366_v59 }
 0x3ad   :  { %v1766_v60 = vpop.f32.mrf.mxu1 }
 0x3ae   :  { %v1387_v61 = vadd.f32 %v1766_v60, %v2246_v3 }
 0x3af   :  { %v1378_v62 = vpop.f32.mrf.mxu1 }
 0x3b0   :  { %1423 = vst [vmem:[#allocation2 + $0xf0] sm:$0xff] %v1387_v61  ;;  %v1379_v63 = vadd.f32 %v2246_v3, %v1378_v62 }
 0x3b1   :  { %v1767_v0 = vpop.f32.mrf.mxu1 }
 0x3b2   :  { %1421 = vst [vmem:[#allocation2 + $0xe0] sm:$0xff] %v1379_v63  ;;  %v1390_v1 = vadd.f32 %v1767_v0, %v2246_v3 }
 0x3b3   :  { %v1381_v2 = vpop.f32.mrf.mxu1 }
 0x3b4   :  { %1424 = vst [vmem:[#allocation2 + $0xf8] sm:$0xff] %v1390_v1  ;;  %v1382_v4 = vadd.f32 %v2246_v3, %v1381_v2 }
 0x3b6   :  { %1422 = vst [vmem:[#allocation2 + $0xe8] sm:$0xff] %v1382_v4 }
 0x3b7   :  { %1841 = shalt.err (!%p1838_p4)
}
 0x3b8   :  { %s1854_s2 = smov 128   ;;  %s1855_s18 = smov 8  }
 0x3b9   :  { %1436 = dma.vmem_to_hbm [thread:$0]  %s1431_s16, 4096, %s2292_s9, [#allocation3], %s1854_s2, %s1854_s2, %s1855_s18  }
 0x3ba   :  { %1850 = dma.done.wait [#allocation3], 4096  }
 0x3bb   :  { %1851 = vsyncadd [#allocation3], 4294963200 }
 0x3bc   :  { %1440 = vsyncpa [#allocation3], 1 }

</bundles_post_ra>
